<compile_context>
chip_gen: v5e
topology: v5e:2x2
jax: 0.10.0
libtpu: 0.0.40
codegen_flags: <defaults>
</compile_context>

<pallas_src>
import functools

import jax
import jax.numpy as jnp
from jax.experimental import pallas as pl
from jax.experimental.pallas import tpu as pltpu

LANE = 128            # lane-dense channel padding (full vreg / MXU width)
STRIDES = (8, 16, 32)
CH = (48, 48, 64)


# ------------------------------ helpers ----------------------------------- #
def _round_up(x, m):
    return ((x + m - 1) // m) * m


def _avg_pool_nhwc(x, s):
    # Non-overlapping average pool with window == stride, channels-last.
    B, H, W, C = x.shape
    return x.reshape(B, H // s, s, W // s, s, C).mean(axis=(2, 4))


# ---------------------------- Pallas kernel -------------------------------- #
def _fused_multilevel_kernel(lvl_ref, rb_ref, x_ref, wp_ref, bp_ref,
                             wd_ref, bd_ref, o_ref):
    """o = relu(x @ Wp[l] + bp[l]) @ Wd[l] + bd[l] for the tile's level l.

    x : (TM, 128)     bf16      wp/wd : (1, 128, 128) bf16
    bp/bd : (1, 1, 128) f32     o     : (TM, 128)     f32
    (lvl_ref / rb_ref are scalar-prefetch tables consumed by the index maps.)
    """
    del lvl_ref, rb_ref
    h = jnp.dot(x_ref[...], wp_ref[0], preferred_element_type=jnp.float32)
    h = jnp.maximum(h + bp_ref[0], 0.0)                 # bias + ReLU in f32
    o = jnp.dot(h.astype(jnp.bfloat16), wd_ref[0],
                preferred_element_type=jnp.float32)
    o_ref[...] = o + bd_ref[0]


# --------------------------- model construction ---------------------------- #
def init_yolo_params(key, nc, anchors, ch=CH, in_ch=3):
    na = len(anchors[0]) // 2
    no = nc + 5 + 4                      # dim=5 plus 4 box params
    cout = na * no
    assert in_ch <= LANE and max(ch) <= LANE and cout <= LANE
    wp_l, bp_l, wd_l, bd_l = [], [], [], []
    for i, c in enumerate(ch):
        # Detect head: nn.Conv2d(c, no*na, 1)  -> weight (c, na*no), bias (na*no,)
        kdw, kdb = jax.random.split(jax.random.fold_in(key, i))
        w_det = 0.05 * jax.random.normal(kdw, (c, cout), dtype=jnp.float32)
        b_det = 0.05 * jax.random.normal(kdb, (cout,), dtype=jnp.float32)
        wd = jnp.zeros((LANE, LANE), jnp.float32).at[:c, :cout].set(w_det)
        bd = jnp.zeros((1, LANE), jnp.float32).at[0, :cout].set(b_det)
        wd_l.append(wd.astype(jnp.bfloat16))
        bd_l.append(bd)

        # Stand-in backbone projection: in_ch -> c (see TODO at top of file).
        kpw, kpb = jax.random.split(jax.random.fold_in(key, 100 + i))
        w_p = 0.1 * jax.random.normal(kpw, (in_ch, c), dtype=jnp.float32)
        b_p = 0.1 * jax.random.normal(kpb, (c,), dtype=jnp.float32)
        wp = jnp.zeros((LANE, LANE), jnp.float32).at[:in_ch, :c].set(w_p)
        bp = jnp.zeros((1, LANE), jnp.float32).at[0, :c].set(b_p)
        wp_l.append(wp.astype(jnp.bfloat16))
        bp_l.append(bp)

    params = {
        "wp": jnp.stack(wp_l),           # (nl, 128, 128) bf16
        "bp": jnp.stack(bp_l),           # (nl, 1, 128)   f32
        "wd": jnp.stack(wd_l),           # (nl, 128, 128) bf16
        "bd": jnp.stack(bd_l),           # (nl, 1, 128)   f32
    }
    return params, na, no


# ------------------------------- forward ----------------------------------- #
@functools.partial(jax.jit, static_argnames=("na", "no"))
def yolo_forward(params, x, *, na, no):
    """x: (B, in_ch, H, W) NCHW f32.  Returns list of (B, na, ny, nx, no) f32."""
    cout = na * no
    B = x.shape[0]
    # Single layout change; everything downstream stays channels-last.
    x_nhwc = jnp.transpose(x, (0, 2, 3, 1)).astype(jnp.float32)

    # Stand-in backbone feature maps (static shapes under jit).
    feats, m_rows = [], []
    for s in STRIDES:
        f = _avg_pool_nhwc(x_nhwc, s)                   # (B, ny, nx, in_ch)
        feats.append(f)
        m_rows.append(f.shape[0] * f.shape[1] * f.shape[2])

    # Row tile: multiple of 128 sized to the largest level, capped at 512.
    tm = int(min(512, _round_up(max(m_rows), 128)))

    # Pack all levels into one row-major slab + tile -> (level, row-block) tables.
    x_chunks, tile_level, tile_row, row_starts = [], [], [], []
    blk = 0
    for i, f in enumerate(feats):
        Bf, ny, nx, cin = f.shape
        M = Bf * ny * nx
        Mp = _round_up(M, tm)
        xr = f.reshape(M, cin)
        xr = jnp.pad(xr, ((0, Mp - M), (0, LANE - cin))).astype(jnp.bfloat16)
        x_chunks.append(xr)
        n_tiles = Mp // tm
        tile_level += [i] * n_tiles
        tile_row += list(range(blk, blk + n_tiles))
        row_starts.append(blk * tm)
        blk += n_tiles

    x_all = jnp.concatenate(x_chunks, axis=0)            # (blk*tm, 128) bf16
    n_tiles_total = blk
    lvl_tbl = jnp.asarray(tile_level, dtype=jnp.int32)
    rb_tbl = jnp.asarray(tile_row, dtype=jnp.int32)

    out = pl.pallas_call(
        _fused_multilevel_kernel,
        out_shape=jax.ShapeDtypeStruct((n_tiles_total * tm, LANE), jnp.float32),
        grid_spec=pltpu.PrefetchScalarGridSpec(
            num_scalar_prefetch=2,
            grid=(n_tiles_total,),
            in_specs=[
                # activation rows for this tile
                pl.BlockSpec((tm, LANE), lambda i, lvl, rb: (rb[i], 0)),
                # per-level weights / biases (resident while level repeats)
                pl.BlockSpec((1, LANE, LANE), lambda i, lvl, rb: (lvl[i], 0, 0)),
                pl.BlockSpec((1, 1, LANE), lambda i, lvl, rb: (lvl[i], 0, 0)),
                pl.BlockSpec((1, LANE, LANE), lambda i, lvl, rb: (lvl[i], 0, 0)),
                pl.BlockSpec((1, 1, LANE), lambda i, lvl, rb: (lvl[i], 0, 0)),
            ],
            out_specs=pl.BlockSpec((tm, LANE), lambda i, lvl, rb: (rb[i], 0)),
        ),
        compiler_params=pltpu.CompilerParams(
            dimension_semantics=("arbitrary",),
        ),
    )(lvl_tbl, rb_tbl, x_all, params["wp"], params["bp"],
      params["wd"], params["bd"])

    # Per-level unpack: channel index c = a*no + o  ==  view(bs, na, no, ny, nx)
    outputs = []
    for i, f in enumerate(feats):
        Bf, ny, nx, _ = f.shape
        M = Bf * ny * nx
        rows = out[row_starts[i]:row_starts[i] + M, :cout]
        y = rows.reshape(B, ny, nx, na, no)
        y = jnp.transpose(y, (0, 3, 1, 2, 4))            # == permute(0,1,3,4,2)
        outputs.append(y)
    return outputs


# ------------------------- pure-JAX reference ------------------------------ #
def yolo_forward_ref(params, x, *, na, no):
    cout = na * no
    B = x.shape[0]
    x_nhwc = jnp.transpose(x, (0, 2, 3, 1)).astype(jnp.float32)
    outs = []
    for i, s in enumerate(STRIDES):
        f = _avg_pool_nhwc(x_nhwc, s)
        Bf, ny, nx, cin = f.shape
        xr = jnp.pad(f.reshape(-1, cin), ((0, 0), (0, LANE - cin)))
        xr = xr.astype(jnp.bfloat16)
        h = jnp.dot(xr, params["wp"][i], preferred_element_type=jnp.float32)
        h = jnp.maximum(h + params["bp"][i], 0.0).astype(jnp.bfloat16)
        o = jnp.dot(h, params["wd"][i], preferred_element_type=jnp.float32)
        o = o + params["bd"][i]
        y = o[:, :cout].reshape(B, ny, nx, na, no)
        outs.append(jnp.transpose(y, (0, 3, 1, 2, 4)))
    return outs


# --------------------------------- main ------------------------------------ #
if __name__ == "__main__":
    nc = 7                                   # -> no = nc + 9 = 16, na = 3
    anchors = (
        (10, 13, 16, 30, 33, 23),
        (30, 61, 62, 45, 59, 119),
        (116, 90, 156, 198, 373, 326),
    )
    key = jax.random.PRNGKey(0)
    kx, kp = jax.random.split(key)

    B, in_ch, H, W = 2, 3, 64, 64            # levels: 8x8, 4x4, 2x2
    x = jax.random.normal(kx, (B, in_ch, H, W), dtype=jnp.float32)

    params, na, no = init_yolo_params(kp, nc, anchors, ch=CH, in_ch=in_ch)

    outs = yolo_forward(params, x, na=na, no=no)
    outs = [jax.block_until_ready(o) for o in outs]

    expected = [(B, na, H // s, W // s, no) for s in STRIDES]
    got = [tuple(o.shape) for o in outs]
    assert got == expected, (got, expected)
    assert all(bool(jnp.all(jnp.isfinite(o))) for o in outs)

    refs = yolo_forward_ref(params, x, na=na, no=no)
    for o, r in zip(outs, refs):
        assert bool(jnp.allclose(o, r, atol=5e-2, rtol=5e-2)), \
            float(jnp.max(jnp.abs(o - r)))

    print("KERNEL_OK")
</pallas_src>

<mosaic_0001>
module attributes {stable_mosaic.version = 11 : i64} {
  func.func @_fused_multilevel_kernel(%arg0: i32, %arg1: memref<3xi32, #tpu.memory_space<smem>>, %arg2: memref<3xi32, #tpu.memory_space<smem>>, %arg3: memref<128x128xbf16, #tpu.memory_space<vmem>>, %arg4: memref<1x128x128xbf16, #tpu.memory_space<vmem>>, %arg5: memref<1x1x128xf32, #tpu.memory_space<vmem>>, %arg6: memref<1x128x128xbf16, #tpu.memory_space<vmem>>, %arg7: memref<1x1x128xf32, #tpu.memory_space<vmem>>, %arg8: memref<128x128xf32, #tpu.memory_space<vmem>>) attributes {dimension_semantics = [#tpu.dimension_semantics<arbitrary>], iteration_bounds = array<i64: 3>, scalar_prefetch = 2 : i64, scratch_operands = 0 : i64, tpu.core_type = #tpu.core_type<tc>, window_params = [{transform_indices = @transform_0, window_bounds = array<i64: 128, 128>}, {transform_indices = @transform_1, window_bounds = array<i64: 1, 128, 128>}, {transform_indices = @transform_2, window_bounds = array<i64: 1, 1, 128>}, {transform_indices = @transform_3, window_bounds = array<i64: 1, 128, 128>}, {transform_indices = @transform_4, window_bounds = array<i64: 1, 1, 128>}, {transform_indices = @transform_5, window_bounds = array<i64: 128, 128>}]} {
    %c0 = arith.constant 0 : index
    %c0_0 = arith.constant 0 : index
    %0 = vector.load %arg3[%c0, %c0_0] : memref<128x128xbf16, #tpu.memory_space<vmem>>, vector<128x128xbf16>
    %c0_1 = arith.constant 0 : index
    %c0_2 = arith.constant 0 : index
    %c0_3 = arith.constant 0 : index
    %1 = vector.load %arg4[%c0_1, %c0_2, %c0_3] : memref<1x128x128xbf16, #tpu.memory_space<vmem>>, vector<1x128x128xbf16>
    %2 = vector.shape_cast %1 : vector<1x128x128xbf16> to vector<128x128xbf16>
    %cst = arith.constant dense<0.000000e+00> : vector<128x128xf32>
    %3 = tpu.matmul %0, %2, %cst {dimension_numbers = #tpu.dot_dimension_numbers<[1], [0], [0], [1], [0, 0, 1, 1], [], []>} : vector<128x128xbf16>, vector<128x128xbf16>, vector<128x128xf32> -> vector<128x128xf32>
    %c0_4 = arith.constant 0 : index
    %c0_5 = arith.constant 0 : index
    %c0_6 = arith.constant 0 : index
    %4 = vector.load %arg5[%c0_4, %c0_5, %c0_6] : memref<1x1x128xf32, #tpu.memory_space<vmem>>, vector<1x1x128xf32>
    %5 = vector.shape_cast %4 : vector<1x1x128xf32> to vector<1x128xf32>
    %6 = vector.broadcast %5 : vector<1x128xf32> to vector<128x128xf32>
    %7 = arith.addf %3, %6 : vector<128x128xf32>
    %cst_7 = arith.constant 0.000000e+00 : f32
    %8 = vector.broadcast %cst_7 : f32 to vector<128x128xf32>
    %9 = arith.maximumf %7, %8 : vector<128x128xf32>
    %10 = arith.truncf %9 : vector<128x128xf32> to vector<128x128xbf16>
    %c0_8 = arith.constant 0 : index
    %c0_9 = arith.constant 0 : index
    %c0_10 = arith.constant 0 : index
    %11 = vector.load %arg6[%c0_8, %c0_9, %c0_10] : memref<1x128x128xbf16, #tpu.memory_space<vmem>>, vector<1x128x128xbf16>
    %12 = vector.shape_cast %11 : vector<1x128x128xbf16> to vector<128x128xbf16>
    %cst_11 = arith.constant dense<0.000000e+00> : vector<128x128xf32>
    %13 = tpu.matmul %10, %12, %cst_11 {dimension_numbers = #tpu.dot_dimension_numbers<[1], [0], [0], [1], [0, 0, 1, 1], [], []>} : vector<128x128xbf16>, vector<128x128xbf16>, vector<128x128xf32> -> vector<128x128xf32>
    %c0_12 = arith.constant 0 : index
    %c0_13 = arith.constant 0 : index
    %c0_14 = arith.constant 0 : index
    %14 = vector.load %arg7[%c0_12, %c0_13, %c0_14] : memref<1x1x128xf32, #tpu.memory_space<vmem>>, vector<1x1x128xf32>
    %15 = vector.shape_cast %14 : vector<1x1x128xf32> to vector<1x128xf32>
    %16 = vector.broadcast %15 : vector<1x128xf32> to vector<128x128xf32>
    %17 = arith.addf %13, %16 : vector<128x128xf32>
    %c0_15 = arith.constant 0 : index
    %c0_16 = arith.constant 0 : index
    %18 = vector.load %arg8[%c0_15, %c0_16] : memref<128x128xf32, #tpu.memory_space<vmem>>, vector<128x128xf32>
    tpu.vector_store %arg8[%c0_15, %c0_16], %17 {strides = array<i32>} : memref<128x128xf32, #tpu.memory_space<vmem>>, vector<128x128xf32>,
    return
  }
  func.func @transform_0(%arg0: i32, %arg1: memref<3xi32, #tpu.memory_space<smem>>, %arg2: memref<3xi32, #tpu.memory_space<smem>>) -> (i32, i32) {
    %0 = arith.index_cast %arg0 : i32 to index
    %1 = memref.load %arg2[%0] : memref<3xi32, #tpu.memory_space<smem>>
    %c0_i32 = arith.constant 0 : i32
    %c0_i32_0 = arith.constant 0 : i32
    return %1, %c0_i32 : i32, i32
  }
  func.func @transform_1(%arg0: i32, %arg1: memref<3xi32, #tpu.memory_space<smem>>, %arg2: memref<3xi32, #tpu.memory_space<smem>>) -> (i32, i32, i32) {
    %0 = arith.index_cast %arg0 : i32 to index
    %1 = memref.load %arg1[%0] : memref<3xi32, #tpu.memory_space<smem>>
    %c0_i32 = arith.constant 0 : i32
    %c0_i32_0 = arith.constant 0 : i32
    %c0_i32_1 = arith.constant 0 : i32
    return %1, %c0_i32, %c0_i32_0 : i32, i32, i32
  }
  func.func @transform_2(%arg0: i32, %arg1: memref<3xi32, #tpu.memory_space<smem>>, %arg2: memref<3xi32, #tpu.memory_space<smem>>) -> (i32, i32, i32) {
    %0 = arith.index_cast %arg0 : i32 to index
    %1 = memref.load %arg1[%0] : memref<3xi32, #tpu.memory_space<smem>>
    %c0_i32 = arith.constant 0 : i32
    %c0_i32_0 = arith.constant 0 : i32
    %c0_i32_1 = arith.constant 0 : i32
    return %1, %c0_i32, %c0_i32_0 : i32, i32, i32
  }
  func.func @transform_3(%arg0: i32, %arg1: memref<3xi32, #tpu.memory_space<smem>>, %arg2: memref<3xi32, #tpu.memory_space<smem>>) -> (i32, i32, i32) {
    %0 = arith.index_cast %arg0 : i32 to index
    %1 = memref.load %arg1[%0] : memref<3xi32, #tpu.memory_space<smem>>
    %c0_i32 = arith.constant 0 : i32
    %c0_i32_0 = arith.constant 0 : i32
    %c0_i32_1 = arith.constant 0 : i32
    return %1, %c0_i32, %c0_i32_0 : i32, i32, i32
  }
  func.func @transform_4(%arg0: i32, %arg1: memref<3xi32, #tpu.memory_space<smem>>, %arg2: memref<3xi32, #tpu.memory_space<smem>>) -> (i32, i32, i32) {
    %0 = arith.index_cast %arg0 : i32 to index
    %1 = memref.load %arg1[%0] : memref<3xi32, #tpu.memory_space<smem>>
    %c0_i32 = arith.constant 0 : i32
    %c0_i32_0 = arith.constant 0 : i32
    %c0_i32_1 = arith.constant 0 : i32
    return %1, %c0_i32, %c0_i32_0 : i32, i32, i32
  }
  func.func @transform_5(%arg0: i32, %arg1: memref<3xi32, #tpu.memory_space<smem>>, %arg2: memref<3xi32, #tpu.memory_space<smem>>) -> (i32, i32) {
    %0 = arith.index_cast %arg0 : i32 to index
    %1 = memref.load %arg2[%0] : memref<3xi32, #tpu.memory_space<smem>>
    %c0_i32 = arith.constant 0 : i32
    %c0_i32_0 = arith.constant 0 : i32
    return %1, %c0_i32 : i32, i32
  }
}

</mosaic_0001>

<bundles_post_ra>
// kernel: yolo_forward.1
= control target key start
LH: loop header
LB: loop body
LE: loop exit
PB: predicated region body
PF: predicated region fallthrough
CT: control target
= control target key end

     0   :  { %s989_s30 = smov [#allocation3]   ;;  %s990_s8 = smov [#allocation4]   ;;  %s1128_s0 = inlined_call_operand.vmem [shape: s32[3], index: 0, kind: input, shape index: {}, may-alias: {0,1}]   ;;  %s1129_s2 = inlined_call_operand.vmem [shape: bf16[384,128], index: 2, kind: input, shape index: {}]   ;;  %s1130_s3 = inlined_call_operand.vmem [shape: bf16[3,128,128], index: 3, kind: input, shape index: {}]   ;;  %s1131_s4 = inlined_call_operand.vmem [shape: f32[3,1,128], index: 4, kind: input, shape index: {}]   ;;  %s1132_s5 = inlined_call_operand.vmem [shape: bf16[3,128,128], index: 5, kind: input, shape index: {}]   ;;  %s1133_s6 = inlined_call_operand.vmem [shape: f32[3,1,128], index: 6, kind: input, shape index: {}]   ;;  %s1134_s7 = inlined_call_operand.vmem [shape: f32[384,128], index: 7, kind: output, shape index: {}]   ;;  %s1135_s1 = inlined_call_operand.vmem [shape: s32[3], index: 1, kind: input, shape index: {}, may-alias: {0,1}]  }
   0x1   :  { %s13_s26 = sshll.u32 %s1128_s0, 4  ;;  %s18_s29 = sshll.u32 %s1135_s1, 4  ;;  %s14_s26 = int_to_ptr.vmem [resolvable:$true] %s13_s26  ;;  %s19_s29 = int_to_ptr.vmem [resolvable:$true] %s18_s29 }
   0x2   :  { %16 = dma.vmem_to_smem %s14_s26, 16, %s989_s30, [#allocation2] }
   0x3   :  { %21 = dma.vmem_to_smem %s19_s29, 16, %s990_s8, [#allocation2] }
   0x4   :  { %983 = dma.done.wait [#allocation2], 32 }
   0x5   :  { %984 = vsyncadd [#allocation2], 4294967264 }
   0x6   :  { %24 = sfence }
   0x7   :  { %s1037_s9 = smov 0  }
   0x8 LB: > { %s1043_s0 = sadd.s32 4294967295, %s987_s9   ;;  %p794_p0 = scmp.ge.s32.totalorder %s987_s9, 1  ;;  %s987_s9 = sphi %s1037_s9, %s30_s9  }
   0x9   : > { %p261_p1 = scmp.lt.s32.totalorder %s987_s9, 4 }
   0xb   : > { %p262_p2 = pnand %p794_p0, %p261_p1 }
   0xc   : > { %s319_s1 = sld [smem:[#allocation3 + %s1043_s0]] (!%p262_p2) }
   0xd   : > { %265 = sbr.rel (%p262_p2) target bundleno = 392 (0x188), region = 40  ;;  %s326_s10 = sld [smem:[#allocation3 + %s1043_s0]] (!%p262_p2) }
   0xe   : > { %s311_s15 = sld [smem:[#allocation4 + %s1043_s0]] (!%p262_p2) }
   0xf   : > { %s331_s24 = sld [smem:[#allocation3 + %s1043_s0]] (!%p262_p2) }
  0x10   : > { %s338_s29 = sld [smem:[#allocation3 + %s1043_s0]] (!%p262_p2) }
  0x12   : > { %p320_p3 = scmp.lt.s32.totalorder %s319_s1, 2 }
  0x13   : > { %p327_p4 = scmp.lt.s32.totalorder %s326_s10, 2 }
  0x14   : > { %s1137_s1 = smov (!%p320_p3, %s319_s1), 2  ;;  %s795_s19 = sshll.u32 %s311_s15, 4 }
  0x15   : > { %s901_s11 = sshll.u32 %s1137_s1, 6  ;;  %s1139_s10 = smov (!%p327_p4, %s326_s10), 2 }
  0x16   : > { %s324_s14 = scalar_lea.vmem %s1130_s3, %s901_s11  ;;  %s329_s18 = scalar_lea.vmem %s1131_s4, %s1139_s10 }
  0x17   : > { %v918_v0 = vld [vmem:[%s324_s14 + $0x38] sm:$0xff]  ;;  %v917_v1 = vld [vmem:[%s324_s14 + $0x30] sm:$0xff]  ;;  %v916_v2 = vld [vmem:[%s324_s14 + $0x28] sm:$0xff]  ;;  %p313_p5 = scmp.lt.s32.totalorder %s795_s19, 47  ;;  %p332_p6 = scmp.lt.s32.totalorder %s331_s24, 2 }
  0x18   : > { %483 = vmatpush.bf16.msra.mxu0 %v918_v0  ;;  %927 = vmatpush.bf16.msra.mxu2 %v918_v0  ;;  %v915_v3 = vld [vmem:[%s324_s14 + $0x20] sm:$0xff]  ;;  %v914_v4 = vld [vmem:[%s324_s14 + $0x18] sm:$0xff]  ;;  %v913_v5 = vld [vmem:[%s324_s14 + $0x10] sm:$0xff]  ;;  %p339_p7 = scmp.lt.s32.totalorder %s338_s29, 2  ;;  %s343_s10 = sld [smem:[#allocation4 + %s1043_s0]] }
  0x19   : > { %s1141_s19 = smov (!%p313_p5, %s795_s19), 47  ;;  %v912_v6 = vld [vmem:[%s324_s14 + $0x8] sm:$0xff]  ;;  %v911_v7 = vld [vmem:[%s324_s14] sm:$0xff]  ;;  %s1143_s24 = smov (!%p332_p6, %s331_s24), 2 }
  0x1a   : > { %s796_s20 = sshll.u32 %s1141_s19, 2  ;;  %s902_s25 = sshll.u32 %s1143_s24, 6  ;;  %v953_v25 = vld [vmem:[%s329_s18] ss:$0 sm:$0xff] }
  0x1b   : > { %s1062_s23 = scalar_lea.vmem %s1129_s2, %s796_s20  ;;  %s1072_s28 = scalar_lea.vmem %s1132_s5, %s902_s25 }
  0x1c   : > { %484 = vmatpush.bf16.msra.mxu0 %v917_v1  ;;  %928 = vmatpush.bf16.msra.mxu2 %v917_v1  ;;  %v903_v8 = vld [vmem:[%s1062_s23] sm:$0xff]  ;;  %v904_v10 = vld [vmem:[%s1062_s23 + $0x8] sm:$0xff]  ;;  %v926_v12 = vld [vmem:[%s1072_s28 + $0x38] sm:$0xff]  ;;  %s1145_s29 = smov (!%p339_p7, %s338_s29), 2 }
  0x1d   : > { %v907_v9 = vld [vmem:[%s1062_s23 + $0x20] sm:$0xff]  ;;  %v908_v11 = vld [vmem:[%s1062_s23 + $0x28] sm:$0xff]  ;;  %624 = vmatpush.bf16.msra.mxu1 %v926_v12  ;;  %v925_v13 = vld [vmem:[%s1072_s28 + $0x30] sm:$0xff]  ;;  %935 = vmatpush.bf16.msra.mxu3 %v926_v12  ;;  %s341_s1 = scalar_lea.vmem %s1133_s6, %s1145_s29 }
  0x1e   : > { %v924_v14 = vld [vmem:[%s1072_s28 + $0x28] sm:$0xff]  ;;  %v923_v15 = vld [vmem:[%s1072_s28 + $0x20] sm:$0xff]  ;;  %v905_v16 = vld [vmem:[%s1062_s23 + $0x10] sm:$0xff]  ;;  %s801_s13 = sshll.u32 %s343_s10, 4 }
  0x1f   : > { %v909_v17 = vld [vmem:[%s1062_s23 + $0x30] sm:$0xff]  ;;  %v906_v18 = vld [vmem:[%s1062_s23 + $0x18] sm:$0xff]  ;;  %v920_v22 = vld [vmem:[%s1072_s28 + $0x8] sm:$0xff]  ;;  %p345_p8 = scmp.lt.s32.totalorder %s801_s13, 47 }
  0x20   : > { %485 = vmatpush.bf16.msra.mxu0 %v916_v2  ;;  %929 = vmatpush.bf16.msra.mxu2 %v916_v2  ;;  %v910_v19 = vld [vmem:[%s1062_s23 + $0x38] sm:$0xff]  ;;  %v921_v21 = vld [vmem:[%s1072_s28 + $0x10] sm:$0xff]  ;;  %v919_v23 = vld [vmem:[%s1072_s28] sm:$0xff] }
  0x21   : > { %625 = vmatpush.bf16.msra.mxu1 %v925_v13  ;;  %936 = vmatpush.bf16.msra.mxu3 %v925_v13  ;;  %v922_v20 = vld [vmem:[%s1072_s28 + $0x18] sm:$0xff]  ;;  %s1147_s13 = smov (!%p345_p8, %s801_s13), 47 }
  0x22   : > { %s802_s14 = sshll.u32 %s1147_s13, 3 }
  0x23   : > { %s1107_s19 = scalar_lea.vmem %s1134_s7, %s802_s14 }
  0x24   : > { %486 = vmatpush.bf16.msra.mxu0 %v915_v3  ;;  %930 = vmatpush.bf16.msra.mxu2 %v915_v3 }
  0x25   : > { %626 = vmatpush.bf16.msra.mxu1 %v924_v14  ;;  %937 = vmatpush.bf16.msra.mxu3 %v924_v14 }
  0x28   : > { %487 = vmatpush.bf16.msra.mxu0 %v914_v4  ;;  %931 = vmatpush.bf16.msra.mxu2 %v914_v4 }
  0x29   : > { %627 = vmatpush.bf16.msra.mxu1 %v923_v15  ;;  %938 = vmatpush.bf16.msra.mxu3 %v923_v15 }
  0x2c   : > { %488 = vmatpush.bf16.msra.mxu0 %v913_v5  ;;  %932 = vmatpush.bf16.msra.mxu2 %v913_v5 }
  0x2d   : > { %628 = vmatpush.bf16.msra.mxu1 %v922_v20  ;;  %939 = vmatpush.bf16.msra.mxu3 %v922_v20 }
  0x30   : > { %489 = vmatpush.bf16.msra.mxu0 %v912_v6  ;;  %933 = vmatpush.bf16.msra.mxu2 %v912_v6 }
  0x31   : > { %629 = vmatpush.bf16.msra.mxu1 %v921_v21  ;;  %940 = vmatpush.bf16.msra.mxu3 %v921_v21 }
  0x34   : > { %490 = vmatpush.bf16.msra.mxu0 %v911_v7  ;;  %934 = vmatpush.bf16.msra.mxu2 %v911_v7 }
  0x35   : > { %630 = vmatpush.bf16.msra.mxu1 %v920_v22  ;;  %941 = vmatpush.bf16.msra.mxu3 %v920_v22 }
  0x37   : > { %491 = vmatmul.bf16.vlgmr.msra.gmra.mxu0 %v903_v8  ;;  %511 = vmatmul.bf16.vlgmr.msra.gmra.mxu2 %v907_v9 }
  0x39   : > { %631 = vmatpush.bf16.msra.mxu1 %v919_v23  ;;  %942 = vmatpush.bf16.msra.mxu3 %v919_v23 }
  0x47   : > { %496 = vmatmul.bf16.gmra.mxu0 %v904_v10  ;;  %516 = vmatmul.bf16.gmra.mxu2 %v908_v11 }
  0x57   : > { %501 = vmatmul.bf16.gmra.mxu0 %v905_v16  ;;  %521 = vmatmul.bf16.gmra.mxu2 %v909_v17  ;;  %v954_v17 = vld [vmem:[%s341_s1] ss:$0 sm:$0xff] }
  0x67   : > { %506 = vmatmul.bf16.gmra.mxu0 %v906_v18  ;;  %526 = vmatmul.bf16.gmra.mxu2 %v910_v19 }
  0xb4   : > { %v492_v24 = vpop.f32.mrf.mxu0 }
  0xb5   : > { %v493_v26 = vadd.f32 %v953_v25, %v492_v24 }
  0xb7   : > { %v532_v29 = vmax.f32 %v493_v26, 0.0 }
  0xba   : > { %v512_v27 = vpop.f32.mrf.mxu2 }
  0xbb   : > { %v513_v32 = vadd.f32 %v953_v25, %v512_v27 }
  0xbc   : > { %v494_v28 = vpop.f32.mrf.mxu0 }
  0xbd   : > { %v495_v30 = vadd.f32 %v953_v25, %v494_v28  ;;  %v540_v37 = vmax.f32 %v513_v32, 0.0 }
  0xbf   : > { %v533_v31 = vmax.f32 %v495_v30, 0.0 }
  0xc1   : > { %v548_v33 = vpack.c.bf16 %v533_v31, %v532_v29 }
  0xc2   : > { %v514_v34 = vpop.f32.mrf.mxu2 }
  0xc3   : > { %v515_v35 = vadd.f32 %v953_v25, %v514_v34  ;;  %632 = vmatmul.bf16.vlgmr.msra.gmra.mxu1 %v548_v33 }
  0xc4   : > { %v497_v36 = vpop.f32.mrf.mxu0 }
  0xc5   : > { %v541_v38 = vmax.f32 %v515_v35, 0.0  ;;  %v498_v40 = vadd.f32 %v953_v25, %v497_v36 }
  0xc7   : > { %v552_v39 = vpack.c.bf16 %v541_v38, %v540_v37  ;;  %v534_v43 = vmax.f32 %v498_v40, 0.0 }
  0xc9   : > { %652 = vmatmul.bf16.vlgmr.msra.gmra.mxu3 %v552_v39 }
  0xca   : > { %v517_v41 = vpop.f32.mrf.mxu2 }
  0xcb   : > { %v518_v46 = vadd.f32 %v953_v25, %v517_v41 }
  0xcc   : > { %v499_v42 = vpop.f32.mrf.mxu0 }
  0xcd   : > { %v500_v44 = vadd.f32 %v953_v25, %v499_v42  ;;  %v542_v51 = vmax.f32 %v518_v46, 0.0 }
  0xcf   : > { %v535_v45 = vmax.f32 %v500_v44, 0.0 }
  0xd1   : > { %v549_v47 = vpack.c.bf16 %v535_v45, %v534_v43 }
  0xd2   : > { %v519_v48 = vpop.f32.mrf.mxu2 }
  0xd3   : > { %v520_v49 = vadd.f32 %v953_v25, %v519_v48  ;;  %637 = vmatmul.bf16.gmra.mxu1 %v549_v47 }
  0xd4   : > { %v502_v50 = vpop.f32.mrf.mxu0 }
  0xd5   : > { %v543_v52 = vmax.f32 %v520_v49, 0.0  ;;  %v503_v54 = vadd.f32 %v953_v25, %v502_v50 }
  0xd7   : > { %v553_v53 = vpack.c.bf16 %v543_v52, %v542_v51  ;;  %v536_v57 = vmax.f32 %v503_v54, 0.0 }
  0xd9   : > { %657 = vmatmul.bf16.gmra.mxu3 %v553_v53 }
  0xda   : > { %v522_v55 = vpop.f32.mrf.mxu2 }
  0xdb   : > { %v523_v60 = vadd.f32 %v953_v25, %v522_v55 }
  0xdc   : > { %v504_v56 = vpop.f32.mrf.mxu0 }
  0xdd   : > { %v505_v58 = vadd.f32 %v953_v25, %v504_v56  ;;  %v544_v1 = vmax.f32 %v523_v60, 0.0 }
  0xdf   : > { %v537_v59 = vmax.f32 %v505_v58, 0.0 }
  0xe1   : > { %v550_v61 = vpack.c.bf16 %v537_v59, %v536_v57 }
  0xe2   : > { %v524_v62 = vpop.f32.mrf.mxu2 }
  0xe3   : > { %v525_v63 = vadd.f32 %v953_v25, %v524_v62  ;;  %642 = vmatmul.bf16.gmra.mxu1 %v550_v61 }
  0xe4   : > { %v507_v0 = vpop.f32.mrf.mxu0 }
  0xe5   : > { %v545_v2 = vmax.f32 %v525_v63, 0.0  ;;  %v508_v4 = vadd.f32 %v953_v25, %v507_v0 }
  0xe7   : > { %v554_v3 = vpack.c.bf16 %v545_v2, %v544_v1  ;;  %v538_v7 = vmax.f32 %v508_v4, 0.0 }
  0xe9   : > { %662 = vmatmul.bf16.gmra.mxu3 %v554_v3 }
  0xea   : > { %v527_v5 = vpop.f32.mrf.mxu2 }
  0xeb   : > { %v528_v10 = vadd.f32 %v953_v25, %v527_v5 }
  0xec   : > { %v509_v6 = vpop.f32.mrf.mxu0 }
  0xed   : > { %v510_v8 = vadd.f32 %v953_v25, %v509_v6  ;;  %v546_v14 = vmax.f32 %v528_v10, 0.0 }
  0xef   : > { %v539_v9 = vmax.f32 %v510_v8, 0.0 }
  0xf1   : > { %v551_v11 = vpack.c.bf16 %v539_v9, %v538_v7 }
  0xf2   : > { %v529_v12 = vpop.f32.mrf.mxu2 }
  0xf3   : > { %v530_v13 = vadd.f32 %v953_v25, %v529_v12  ;;  %647 = vmatmul.bf16.gmra.mxu1 %v551_v11 }
  0xf5   : > { %v547_v15 = vmax.f32 %v530_v13, 0.0 }
  0xf7   : > { %v555_v16 = vpack.c.bf16 %v547_v15, %v546_v14 }
  0xf9   : > { %667 = vmatmul.bf16.gmra.mxu3 %v555_v16 }
 0x140   : > { %v633_v18 = vpop.f32.mrf.mxu1 }
 0x141   : > { %v634_v19 = vadd.f32 %v954_v17, %v633_v18 }
 0x143   : > { %673 = vst [vmem:[%s1107_s19] sm:$0xff] %v634_v19 }
 0x148   : > { %v635_v20 = vpop.f32.mrf.mxu1 }
 0x149   : > { %v636_v21 = vadd.f32 %v954_v17, %v635_v20 }
 0x14b   : > { %674 = vst [vmem:[%s1107_s19 + $0x8] sm:$0xff] %v636_v21 }
 0x14c   : > { %v653_v22 = vpop.f32.mrf.mxu3 }
 0x14d   : > { %v654_v23 = vadd.f32 %v954_v17, %v653_v22 }
 0x14f   : > { %681 = vst [vmem:[%s1107_s19 + $0x40] sm:$0xff] %v654_v23 }
 0x150   : > { %v638_v24 = vpop.f32.mrf.mxu1 }
 0x151   : > { %v639_v25 = vadd.f32 %v954_v17, %v638_v24 }
 0x153   : > { %675 = vst [vmem:[%s1107_s19 + $0x10] sm:$0xff] %v639_v25 }
 0x154   : > { %v655_v26 = vpop.f32.mrf.mxu3 }
 0x155   : > { %v656_v27 = vadd.f32 %v954_v17, %v655_v26 }
 0x157   : > { %682 = vst [vmem:[%s1107_s19 + $0x48] sm:$0xff] %v656_v27 }
 0x158   : > { %v640_v28 = vpop.f32.mrf.mxu1 }
 0x159   : > { %v641_v29 = vadd.f32 %v954_v17, %v640_v28 }
 0x15b   : > { %676 = vst [vmem:[%s1107_s19 + $0x18] sm:$0xff] %v641_v29 }
 0x15c   : > { %v658_v30 = vpop.f32.mrf.mxu3 }
 0x15d   : > { %v659_v31 = vadd.f32 %v954_v17, %v658_v30 }
 0x15f   : > { %683 = vst [vmem:[%s1107_s19 + $0x50] sm:$0xff] %v659_v31 }
 0x160   : > { %v643_v32 = vpop.f32.mrf.mxu1 }
 0x161   : > { %v644_v33 = vadd.f32 %v954_v17, %v643_v32 }
 0x163   : > { %677 = vst [vmem:[%s1107_s19 + $0x20] sm:$0xff] %v644_v33 }
 0x164   : > { %v660_v34 = vpop.f32.mrf.mxu3 }
 0x165   : > { %v661_v35 = vadd.f32 %v954_v17, %v660_v34 }
 0x167   : > { %684 = vst [vmem:[%s1107_s19 + $0x58] sm:$0xff] %v661_v35 }
 0x168   : > { %v645_v36 = vpop.f32.mrf.mxu1 }
 0x169   : > { %v646_v37 = vadd.f32 %v954_v17, %v645_v36 }
 0x16b   : > { %678 = vst [vmem:[%s1107_s19 + $0x28] sm:$0xff] %v646_v37 }
 0x16c   : > { %v663_v38 = vpop.f32.mrf.mxu3 }
 0x16d   : > { %v664_v39 = vadd.f32 %v954_v17, %v663_v38 }
 0x16f   : > { %685 = vst [vmem:[%s1107_s19 + $0x60] sm:$0xff] %v664_v39 }
 0x170   : > { %v648_v40 = vpop.f32.mrf.mxu1 }
 0x171   : > { %v649_v41 = vadd.f32 %v954_v17, %v648_v40 }
 0x173   : > { %679 = vst [vmem:[%s1107_s19 + $0x30] sm:$0xff] %v649_v41 }
 0x174   : > { %v665_v42 = vpop.f32.mrf.mxu3 }
 0x175   : > { %v666_v43 = vadd.f32 %v954_v17, %v665_v42 }
 0x177   : > { %686 = vst [vmem:[%s1107_s19 + $0x68] sm:$0xff] %v666_v43 }
 0x178   : > { %v650_v44 = vpop.f32.mrf.mxu1 }
 0x179   : > { %v651_v45 = vadd.f32 %v954_v17, %v650_v44 }
 0x17b   : > { %680 = vst [vmem:[%s1107_s19 + $0x38] sm:$0xff] %v651_v45 }
 0x17c   : > { %v668_v46 = vpop.f32.mrf.mxu3 }
 0x17d   : > { %v669_v47 = vadd.f32 %v954_v17, %v668_v46 }
 0x17f   : > { %687 = vst [vmem:[%s1107_s19 + $0x70] sm:$0xff] %v669_v47 }
 0x184   : > { %v670_v48 = vpop.f32.mrf.mxu3 }
 0x185   : > { %v671_v49 = vadd.f32 %v954_v17, %v670_v48 }
 0x187   : > { %688 = vst [vmem:[%s1107_s19 + $0x78] sm:$0xff] %v671_v49 }
 0x188 PF: > { %s30_s9 = sadd.s32 1, %s987_s9  }
 0x189   : > { %p27_p9 = scmp.ge.s32.totalorder %s30_s9, 5  }
 0x18b   :  { %29 = sbr.rel (!%p27_p9) target bundleno = 8 (0x8), region = 82 }

</bundles_post_ra>
